<compile_context>
chip_gen: v7x
topology: tpu7x:2x2x1
jax: 0.10.0
libtpu: 0.0.40
codegen_flags: <defaults>
</compile_context>

<pallas_src>
import functools
import math

import jax
import jax.numpy as jnp
from jax.experimental import pallas as pl
from jax.experimental.pallas import tpu as pltpu

# Powers of the adjacency matrix (module default p=[0, 1, 2]).
# TODO(synk): kernel is specialized to the contiguous default p=[0,1,2]; an
# arbitrary power list would need a static hop -> output-slot table.
P_LIST = (0, 1, 2)
NP = len(P_LIST)          # number of concatenated projections
NHOP = max(P_LIST)        # number of propagation hops actually needed (= 2)


def _round_up(x, m):
    return (x + m - 1) // m * m


def _mixhop_kernel(a_ref, f0_ref, w_ref, out_ref, feats_scr, acc_ref, *, nk):
    """One grid step = (hop h, destination row-block i, source block k).

    a_ref    : (tm, tk)        bf16  tile of A_hat = D^-1/2 A^T D^-1/2 (streamed)
    f0_ref   : (N_pad, Fp)     bf16  power-0 features (resident)
    w_ref    : (P, Fp, Fo)     bf16  stacked, padded W_j^T (resident)
    out_ref  : (1, tm, Fo)     f32   lane-dense slab for one (power, row-block)
    feats_scr: (2, N_pad, Fp)  bf16  ping-pong scratch: slot h%2 holds feats_h
    acc_ref  : (tm, Fp)        f32   propagation accumulator for this row block
    """
    h = pl.program_id(0)
    i = pl.program_id(1)
    k = pl.program_id(2)
    tm, tk = a_ref.shape

    rd = h % 2          # slot holding feats_h (read this hop)
    wr = (h + 1) % 2    # slot receiving feats_{h+1} (written this hop)

    # One-time: stage the power-0 features into slot 0 of the ping-pong scratch.
    @pl.when((h == 0) & (i == 0) & (k == 0))
    def _():
        feats_scr[0] = f0_ref[...]

    row0 = pl.multiple_of(i * tm, tm)

    # Projection for power h: feats_h[row block] @ W_h (feats_h was completed
    # during hop h-1; at h==0 it is the staged input).  Written once per (h, i).
    @pl.when(k == 0)
    def _():
        cur = feats_scr[rd, pl.ds(row0, tm), :]                    # (tm, Fp) bf16
        out_ref[0] = jnp.dot(cur, w_ref[h],
                             preferred_element_type=jnp.float32)

    # Propagation partial product: acc += A_hat[i, k] @ feats_h[k block].
    col0 = pl.multiple_of(k * tk, tk)
    src = feats_scr[rd, pl.ds(col0, tk), :]                        # (tk, Fp) bf16
    part = jnp.dot(a_ref[...], src, preferred_element_type=jnp.float32)

    @pl.when(k == 0)
    def _():
        acc_ref[...] = part

    @pl.when(k != 0)
    def _():
        acc_ref[...] += part

    # Finalize feats_{h+1}[row block].  Store it only if a later hop reads it;
    # on the last hop, emit the highest power's projection instead (its output
    # block is selected by the output index_map at k == nk-1).
    @pl.when(k == nk - 1)
    def _():
        nxt = acc_ref[...].astype(feats_scr.dtype)                 # (tm, Fp) bf16

        @pl.when(h < NHOP - 1)
        def _():
            feats_scr[wr, pl.ds(row0, tm), :] = nxt

        @pl.when(h == NHOP - 1)
        def _():
            out_ref[0] = jnp.dot(nxt, w_ref[NP - 1],
                                 preferred_element_type=jnp.float32)


def mixhop_forward(adj, feats, w, *, tm=512, tk=512):
    """MixHopConv forward.

    adj  : (N, N) dense adjacency, adj[src, dst] = 1 for an edge src -> dst.
    feats: (N, Fin) node features.
    w    : (P, Fin, Fout) stacked, pre-transposed Linear weights (y_j = x @ w[j]).
    Returns (N, P*Fout), i.e. torch.cat(outputs, dim=1).
    """
    assert tm % 128 == 0 and tk % 128 == 0
    n, fin = feats.shape
    npow, fin_w, fout = w.shape
    assert npow == NP and fin_w == fin

    # ---- graph preprocessing (glue): fold symmetric normalization into A ----
    adj = adj.astype(jnp.float32)
    degs = jnp.maximum(adj.sum(axis=0), 1.0)            # in_degrees().clamp(min=1)
    norm = degs ** -0.5                                 # (N,)
    a_hat = (norm[:, None] * adj.T) * norm[None, :]     # D^-1/2 A^T D^-1/2

    # ---- pad to TPU-friendly shapes (exact: zero rows/cols contribute 0) ----
    n_pad = _round_up(max(n, 256), 256)
    fin_p = _round_up(max(fin, 128), 128)
    fout_p = _round_up(max(fout, 128), 128)
    tm_e = math.gcd(tm, n_pad)            # multiple of 128, divides n_pad
    tk_e = math.gcd(tk, n_pad // 2)       # multiple of 128, guarantees nk >= 2
    ni, nk = n_pad // tm_e, n_pad // tk_e

    a_p = jnp.zeros((n_pad, n_pad), jnp.bfloat16).at[:n, :n].set(
        a_hat.astype(jnp.bfloat16))
    f_p = jnp.zeros((n_pad, fin_p), jnp.bfloat16).at[:n, :fin].set(
        feats.astype(jnp.bfloat16))
    w_p = jnp.zeros((NP, fin_p, fout_p), jnp.bfloat16).at[:, :fin, :fout].set(
        w.astype(jnp.bfloat16))

    # Output power slot: slot h while streaming hop h; the highest power's
    # projection is emitted at the last (hop, k) step of each row block.
    def out_index_map(h, i, k):
        slot = jnp.where((h == NHOP - 1) & (k == nk - 1), NP - 1, h)
        return (slot, i, 0)

    vmem_est = (2 * tm_e * tk_e * 2               # double-buffered A_hat tiles
                + 2 * n_pad * fin_p * 2           # resident feats_0 input
                + 2 * NP * fin_p * fout_p * 2     # resident weights
                + 2 * tm_e * fout_p * 4           # output slab buffers
                + 2 * n_pad * fin_p * 2           # ping-pong feats scratch
                + tm_e * fin_p * 4)               # accumulator
    vmem_limit = int(min(96 * 2**20, max(16 * 2**20, 2 * vmem_est)))

    flops = 2 * NHOP * n_pad * n_pad * fin_p + 2 * NP * n_pad * fin_p * fout_p
    bytes_accessed = (NHOP * n_pad * n_pad * 2      # A_hat streamed once per hop
                      + n_pad * fin_p * 2           # feats_0
                      + NP * fin_p * fout_p * 2     # weights
                      + NP * n_pad * fout_p * 4)    # output slab

    out = pl.pallas_call(
        functools.partial(_mixhop_kernel, nk=nk),
        out_shape=jax.ShapeDtypeStruct((NP, n_pad, fout_p), jnp.float32),
        grid_spec=pltpu.PrefetchScalarGridSpec(
            num_scalar_prefetch=0,
            grid=(NHOP, ni, nk),
            in_specs=[
                pl.BlockSpec((tm_e, tk_e), lambda h, i, k: (i, k)),        # A_hat
                pl.BlockSpec((n_pad, fin_p), lambda h, i, k: (0, 0)),      # feats_0
                pl.BlockSpec((NP, fin_p, fout_p), lambda h, i, k: (0, 0, 0)),  # W
            ],
            out_specs=pl.BlockSpec((1, tm_e, fout_p), out_index_map),
            scratch_shapes=[
                pltpu.VMEM((2, n_pad, fin_p), jnp.bfloat16),
                pltpu.VMEM((tm_e, fin_p), jnp.float32),
            ],
        ),
        # Hop and k axes carry sequential dependences; the row axis shares the
        # resident feats scratch across hops, so it must stay 'arbitrary' too.
        compiler_params=pltpu.CompilerParams(
            dimension_semantics=("arbitrary", "arbitrary", "arbitrary"),
            vmem_limit_bytes=vmem_limit,
        ),
        cost_estimate=pl.CostEstimate(flops=flops, transcendentals=0,
                                      bytes_accessed=bytes_accessed),
    )(a_p, f_p, w_p)

    # (P, N_pad, Fout_pad) lane-dense slab -> (N, P*Fout) concat layout.
    return out[:, :n, :fout].transpose(1, 0, 2).reshape(n, NP * fout)


if __name__ == "__main__":
    N, FIN, FOUT = 300, 32, 16
    key = jax.random.PRNGKey(0)
    k_adj, k_feat, k_w = jax.random.split(key, 3)

    # Deterministic random directed graph: adj[src, dst] = 1 iff edge src->dst.
    adj = (jax.random.uniform(k_adj, (N, N)) < 0.05).astype(jnp.float32)
    feats = jax.random.normal(k_feat, (N, FIN), dtype=jnp.float32)

    # nn.Linear(in_dim, out_dim, bias=False): y = x @ W.T ; store W.T directly.
    bound = 1.0 / math.sqrt(FIN)
    w = jax.random.uniform(k_w, (NP, FIN, FOUT), minval=-bound, maxval=bound,
                           dtype=jnp.float32)

    out = jax.block_until_ready(mixhop_forward(adj, feats, w, tm=128, tk=128))

    # Pure-JAX reference on the same bf16-rounded operands / f32 accumulation.
    degs = jnp.maximum(adj.sum(axis=0), 1.0)
    norm = degs ** -0.5
    a_hat = ((norm[:, None] * adj.T) * norm[None, :])
    a_hat = a_hat.astype(jnp.bfloat16).astype(jnp.float32)
    f = feats.astype(jnp.bfloat16).astype(jnp.float32)
    wf = w.astype(jnp.bfloat16).astype(jnp.float32)
    hi = jax.lax.Precision.HIGHEST
    refs = []
    for j in range(NHOP + 1):
        if j in P_LIST:
            refs.append(jnp.dot(f, wf[j], precision=hi))
        if j < NHOP:
            f = jnp.dot(a_hat, f, precision=hi)
            f = f.astype(jnp.bfloat16).astype(jnp.float32)
    ref = jnp.concatenate(refs, axis=1)

    assert out.shape == (N, NP * FOUT), out.shape
    err = jnp.max(jnp.abs(out - ref))
    assert jnp.allclose(out, ref, atol=1e-2, rtol=1e-2), f"max abs err {err}"
    print("KERNEL_OK")
</pallas_src>

<mosaic_0001>
module attributes {stable_mosaic.version = 11 : i64} {
  func.func @_mixhop_kernel(%arg0: i32, %arg1: i32, %arg2: i32, %arg3: memref<128x128xbf16, #tpu.memory_space<vmem>>, %arg4: memref<512x128xbf16, #tpu.memory_space<vmem>>, %arg5: memref<3x128x128xbf16, #tpu.memory_space<vmem>>, %arg6: memref<1x128x128xf32, #tpu.memory_space<vmem>>, %arg7: memref<2x512x128xbf16, #tpu.memory_space<vmem>>, %arg8: memref<128x128xf32, #tpu.memory_space<vmem>>) attributes {dimension_semantics = [#tpu.dimension_semantics<arbitrary>, #tpu.dimension_semantics<arbitrary>, #tpu.dimension_semantics<arbitrary>], iteration_bounds = array<i64: 2, 4, 4>, scalar_prefetch = 0 : i64, scratch_operands = 2 : i64, tpu.core_type = #tpu.core_type<tc>, window_params = [{transform_indices = @transform_0, window_bounds = array<i64: 128, 128>}, {pipeline_mode = #tpu.pipeline_mode<synchronous>, transform_indices = @transform_1, window_bounds = array<i64: 512, 128>}, {pipeline_mode = #tpu.pipeline_mode<synchronous>, transform_indices = @transform_2, window_bounds = array<i64: 3, 128, 128>}, {transform_indices = @transform_3, window_bounds = array<i64: 1, 128, 128>}]} {
    %c2_i32 = arith.constant 2 : i32
    %c0_i32 = arith.constant 0 : i32
    %0 = arith.cmpi eq, %c2_i32, %c0_i32 : i32
    %c1_i32 = arith.constant 1 : i32
    %1 = arith.select %0, %c1_i32, %c2_i32 : i32
    %2 = arith.remsi %arg0, %1 : i32
    %c0_i32_0 = arith.constant 0 : i32
    %3 = arith.cmpi ne, %2, %c0_i32_0 : i32
    %c0_i32_1 = arith.constant 0 : i32
    %4 = arith.cmpi slt, %2, %c0_i32_1 : i32
    %c0_i32_2 = arith.constant 0 : i32
    %5 = arith.cmpi slt, %1, %c0_i32_2 : i32
    %6 = arith.xori %4, %5 : i1
    %7 = arith.andi %6, %3 : i1
    %8 = arith.addi %2, %1 : i32
    %9 = arith.select %7, %8, %2 : i32
    %c1_i32_3 = arith.constant 1 : i32
    %10 = arith.addi %arg0, %c1_i32_3 : i32
    %c2_i32_4 = arith.constant 2 : i32
    %c0_i32_5 = arith.constant 0 : i32
    %11 = arith.cmpi eq, %c2_i32_4, %c0_i32_5 : i32
    %c1_i32_6 = arith.constant 1 : i32
    %12 = arith.select %11, %c1_i32_6, %c2_i32_4 : i32
    %13 = arith.remsi %10, %12 : i32
    %c0_i32_7 = arith.constant 0 : i32
    %14 = arith.cmpi ne, %13, %c0_i32_7 : i32
    %c0_i32_8 = arith.constant 0 : i32
    %15 = arith.cmpi slt, %13, %c0_i32_8 : i32
    %c0_i32_9 = arith.constant 0 : i32
    %16 = arith.cmpi slt, %12, %c0_i32_9 : i32
    %17 = arith.xori %15, %16 : i1
    %18 = arith.andi %17, %14 : i1
    %19 = arith.addi %13, %12 : i32
    %20 = arith.select %18, %19, %13 : i32
    %c0_i32_10 = arith.constant 0 : i32
    %21 = arith.cmpi eq, %arg0, %c0_i32_10 : i32
    %c0_i32_11 = arith.constant 0 : i32
    %22 = arith.cmpi eq, %arg1, %c0_i32_11 : i32
    %23 = arith.andi %21, %22 : i1
    %c0_i32_12 = arith.constant 0 : i32
    %24 = arith.cmpi eq, %arg2, %c0_i32_12 : i32
    %25 = arith.andi %23, %24 : i1
    %26 = arith.extui %25 : i1 to i32
    %c0_i32_13 = arith.constant 0 : i32
    %27 = arith.cmpi ne, %26, %c0_i32_13 : i32
    scf.if %27 {
      %c0_24 = arith.constant 0 : index
      %c0_25 = arith.constant 0 : index
      %50 = vector.load %arg4[%c0_24, %c0_25] : memref<512x128xbf16, #tpu.memory_space<vmem>>, vector<512x128xbf16>
      %c0_26 = arith.constant 0 : index
      %c0_27 = arith.constant 0 : index
      %c0_28 = arith.constant 0 : index
      %51 = vector.load %arg7[%c0_26, %c0_27, %c0_28] : memref<2x512x128xbf16, #tpu.memory_space<vmem>>, vector<1x512x128xbf16>
      %52 = vector.shape_cast %51 : vector<1x512x128xbf16> to vector<512x128xbf16>
      %53 = vector.shape_cast %50 : vector<512x128xbf16> to vector<1x512x128xbf16>
      tpu.vector_store %arg7[%c0_26, %c0_27, %c0_28], %53 {strides = array<i32>} : memref<2x512x128xbf16, #tpu.memory_space<vmem>>, vector<1x512x128xbf16>,
    } else {
    }
    %c128_i32 = arith.constant 128 : i32
    %28 = arith.muli %arg1, %c128_i32 : i32
    %29 = tpu.assume_multiple %28, 128 : i32
    %c0_i32_14 = arith.constant 0 : i32
    %30 = arith.cmpi eq, %arg2, %c0_i32_14 : i32
    %31 = arith.extui %30 : i1 to i32
    %c0_i32_15 = arith.constant 0 : i32
    %32 = arith.cmpi ne, %31, %c0_i32_15 : i32
    scf.if %32 {
      %50 = arith.index_cast %9 : i32 to index
      %51 = arith.index_cast %29 : i32 to index
      %c0_24 = arith.constant 0 : index
      %52 = vector.load %arg7[%50, %51, %c0_24] : memref<2x512x128xbf16, #tpu.memory_space<vmem>>, vector<1x128x128xbf16>
      %53 = vector.shape_cast %52 : vector<1x128x128xbf16> to vector<128x128xbf16>
      %54 = arith.index_cast %arg0 : i32 to index
      %c0_25 = arith.constant 0 : index
      %c0_26 = arith.constant 0 : index
      %55 = vector.load %arg5[%54, %c0_25, %c0_26] : memref<3x128x128xbf16, #tpu.memory_space<vmem>>, vector<1x128x128xbf16>
      %56 = vector.shape_cast %55 : vector<1x128x128xbf16> to vector<128x128xbf16>
      %cst_27 = arith.constant dense<0.000000e+00> : vector<128x128xf32>
      %57 = tpu.matmul %53, %56, %cst_27 {dimension_numbers = #tpu.dot_dimension_numbers<[1], [0], [0], [1], [0, 0, 1, 1], [], []>} : vector<128x128xbf16>, vector<128x128xbf16>, vector<128x128xf32> -> vector<128x128xf32>
      %c0_28 = arith.constant 0 : index
      %c0_29 = arith.constant 0 : index
      %c0_30 = arith.constant 0 : index
      %58 = vector.load %arg6[%c0_28, %c0_29, %c0_30] : memref<1x128x128xf32, #tpu.memory_space<vmem>>, vector<1x128x128xf32>
      %59 = vector.shape_cast %58 : vector<1x128x128xf32> to vector<128x128xf32>
      %60 = vector.shape_cast %57 : vector<128x128xf32> to vector<1x128x128xf32>
      tpu.vector_store %arg6[%c0_28, %c0_29, %c0_30], %60 {strides = array<i32>} : memref<1x128x128xf32, #tpu.memory_space<vmem>>, vector<1x128x128xf32>,
    } else {
    }
    %c128_i32_16 = arith.constant 128 : i32
    %33 = arith.muli %arg2, %c128_i32_16 : i32
    %34 = tpu.assume_multiple %33, 128 : i32
    %35 = arith.index_cast %9 : i32 to index
    %36 = arith.index_cast %34 : i32 to index
    %c0 = arith.constant 0 : index
    %37 = vector.load %arg7[%35, %36, %c0] : memref<2x512x128xbf16, #tpu.memory_space<vmem>>, vector<1x128x128xbf16>
    %38 = vector.shape_cast %37 : vector<1x128x128xbf16> to vector<128x128xbf16>
    %c0_17 = arith.constant 0 : index
    %c0_18 = arith.constant 0 : index
    %39 = vector.load %arg3[%c0_17, %c0_18] : memref<128x128xbf16, #tpu.memory_space<vmem>>, vector<128x128xbf16>
    %cst = arith.constant dense<0.000000e+00> : vector<128x128xf32>
    %40 = tpu.matmul %39, %38, %cst {dimension_numbers = #tpu.dot_dimension_numbers<[1], [0], [0], [1], [0, 0, 1, 1], [], []>} : vector<128x128xbf16>, vector<128x128xbf16>, vector<128x128xf32> -> vector<128x128xf32>
    %c0_i32_19 = arith.constant 0 : i32
    %41 = arith.cmpi eq, %arg2, %c0_i32_19 : i32
    %42 = arith.extui %41 : i1 to i32
    %c0_i32_20 = arith.constant 0 : i32
    %43 = arith.cmpi ne, %42, %c0_i32_20 : i32
    scf.if %43 {
      %c0_24 = arith.constant 0 : index
      %c0_25 = arith.constant 0 : index
      %50 = vector.load %arg8[%c0_24, %c0_25] : memref<128x128xf32, #tpu.memory_space<vmem>>, vector<128x128xf32>
      tpu.vector_store %arg8[%c0_24, %c0_25], %40 {strides = array<i32>} : memref<128x128xf32, #tpu.memory_space<vmem>>, vector<128x128xf32>,
    } else {
    }
    %c0_i32_21 = arith.constant 0 : i32
    %44 = arith.cmpi ne, %arg2, %c0_i32_21 : i32
    %45 = arith.extui %44 : i1 to i32
    %c0_i32_22 = arith.constant 0 : i32
    %46 = arith.cmpi ne, %45, %c0_i32_22 : i32
    scf.if %46 {
      %c0_24 = arith.constant 0 : index
      %c0_25 = arith.constant 0 : index
      %50 = vector.load %arg8[%c0_24, %c0_25] : memref<128x128xf32, #tpu.memory_space<vmem>>, vector<128x128xf32>
      %51 = arith.addf %50, %40 : vector<128x128xf32>
      %c0_26 = arith.constant 0 : index
      %c0_27 = arith.constant 0 : index
      %52 = vector.load %arg8[%c0_26, %c0_27] : memref<128x128xf32, #tpu.memory_space<vmem>>, vector<128x128xf32>
      tpu.vector_store %arg8[%c0_26, %c0_27], %51 {strides = array<i32>} : memref<128x128xf32, #tpu.memory_space<vmem>>, vector<128x128xf32>,
    } else {
    }
    %c3_i32 = arith.constant 3 : i32
    %47 = arith.cmpi eq, %arg2, %c3_i32 : i32
    %48 = arith.extui %47 : i1 to i32
    %c0_i32_23 = arith.constant 0 : i32
    %49 = arith.cmpi ne, %48, %c0_i32_23 : i32
    scf.if %49 {
      %c0_24 = arith.constant 0 : index
      %c0_25 = arith.constant 0 : index
      %50 = vector.load %arg8[%c0_24, %c0_25] : memref<128x128xf32, #tpu.memory_space<vmem>>, vector<128x128xf32>
      %51 = arith.truncf %50 : vector<128x128xf32> to vector<128x128xbf16>
      %c1_i32_26 = arith.constant 1 : i32
      %52 = arith.cmpi slt, %arg0, %c1_i32_26 : i32
      %53 = arith.extui %52 : i1 to i32
      %c0_i32_27 = arith.constant 0 : i32
      %54 = arith.cmpi ne, %53, %c0_i32_27 : i32
      scf.if %54 {
        %58 = arith.index_cast %20 : i32 to index
        %59 = arith.index_cast %29 : i32 to index
        %c0_30 = arith.constant 0 : index
        %60 = vector.load %arg7[%58, %59, %c0_30] : memref<2x512x128xbf16, #tpu.memory_space<vmem>>, vector<1x128x128xbf16>
        %61 = vector.shape_cast %60 : vector<1x128x128xbf16> to vector<128x128xbf16>
        %62 = vector.shape_cast %51 : vector<128x128xbf16> to vector<1x128x128xbf16>
        tpu.vector_store %arg7[%58, %59, %c0_30], %62 {strides = array<i32>} : memref<2x512x128xbf16, #tpu.memory_space<vmem>>, vector<1x128x128xbf16>,
      } else {
      }
      %c1_i32_28 = arith.constant 1 : i32
      %55 = arith.cmpi eq, %arg0, %c1_i32_28 : i32
      %56 = arith.extui %55 : i1 to i32
      %c0_i32_29 = arith.constant 0 : i32
      %57 = arith.cmpi ne, %56, %c0_i32_29 : i32
      scf.if %57 {
        %c2 = arith.constant 2 : index
        %c0_30 = arith.constant 0 : index
        %c0_31 = arith.constant 0 : index
        %58 = vector.load %arg5[%c2, %c0_30, %c0_31] : memref<3x128x128xbf16, #tpu.memory_space<vmem>>, vector<1x128x128xbf16>
        %59 = vector.shape_cast %58 : vector<1x128x128xbf16> to vector<128x128xbf16>
        %cst_32 = arith.constant dense<0.000000e+00> : vector<128x128xf32>
        %60 = tpu.matmul %51, %59, %cst_32 {dimension_numbers = #tpu.dot_dimension_numbers<[1], [0], [0], [1], [0, 0, 1, 1], [], []>} : vector<128x128xbf16>, vector<128x128xbf16>, vector<128x128xf32> -> vector<128x128xf32>
        %c0_33 = arith.constant 0 : index
        %c0_34 = arith.constant 0 : index
        %c0_35 = arith.constant 0 : index
        %61 = vector.load %arg6[%c0_33, %c0_34, %c0_35] : memref<1x128x128xf32, #tpu.memory_space<vmem>>, vector<1x128x128xf32>
        %62 = vector.shape_cast %61 : vector<1x128x128xf32> to vector<128x128xf32>
        %63 = vector.shape_cast %60 : vector<128x128xf32> to vector<1x128x128xf32>
        tpu.vector_store %arg6[%c0_33, %c0_34, %c0_35], %63 {strides = array<i32>} : memref<1x128x128xf32, #tpu.memory_space<vmem>>, vector<1x128x128xf32>,
      } else {
      }
    } else {
    }
    return
  }
  func.func @transform_0(%arg0: i32, %arg1: i32, %arg2: i32) -> (i32, i32) {
    %c0_i32 = arith.constant 0 : i32
    return %arg1, %arg2 : i32, i32
  }
  func.func @transform_1(%arg0: i32, %arg1: i32, %arg2: i32) -> (i32, i32) {
    %c0_i32 = arith.constant 0 : i32
    %c0_i32_0 = arith.constant 0 : i32
    %c0_i32_1 = arith.constant 0 : i32
    return %c0_i32, %c0_i32_0 : i32, i32
  }
  func.func @transform_2(%arg0: i32, %arg1: i32, %arg2: i32) -> (i32, i32, i32) {
    %c0_i32 = arith.constant 0 : i32
    %c0_i32_0 = arith.constant 0 : i32
    %c0_i32_1 = arith.constant 0 : i32
    %c0_i32_2 = arith.constant 0 : i32
    return %c0_i32, %c0_i32_0, %c0_i32_1 : i32, i32, i32
  }
  func.func @transform_3(%arg0: i32, %arg1: i32, %arg2: i32) -> (i32, i32, i32) {
    %c1_i32 = arith.constant 1 : i32
    %0 = arith.cmpi eq, %arg0, %c1_i32 : i32
    %c3_i32 = arith.constant 3 : i32
    %1 = arith.cmpi eq, %arg2, %c3_i32 : i32
    %2 = arith.andi %0, %1 : i1
    %c2_i32 = arith.constant 2 : i32
    %3 = arith.select %2, %c2_i32, %arg0 : i32
    %c0_i32 = arith.constant 0 : i32
    %c0_i32_0 = arith.constant 0 : i32
    return %3, %arg1, %c0_i32 : i32, i32, i32
  }
}

</mosaic_0001>

<bundles_post_ra>
// kernel: tpu_custom_call.1
= control target key start
LH: loop header
LB: loop body
LE: loop exit
PB: predicated region body
PF: predicated region fallthrough
CT: control target
= control target key end

     0   :  { %s2661_s0 = inlined_call_operand.hbm [shape: bf16[512,512], index: 0, kind: input, shape index: {}]   ;;  %s2662_s1 = inlined_call_operand.hbm [shape: bf16[512,128], index: 1, kind: input, shape index: {}]   ;;  %s2663_s2 = inlined_call_operand.hbm [shape: bf16[3,128,128], index: 2, kind: input, shape index: {}]   ;;  %s2664_s3 = inlined_call_operand.hbm [shape: f32[3,512,128], index: 3, kind: output, shape index: {}]  }
   0x1   :  { %2682 = sst [smem:[#allocation21_spill]] %s2662_s1 }
   0x2   :  { %2683 = sst [smem:[#allocation22_spill]] %s2663_s2 }
   0x3   :  { %2684 = sst [smem:[#allocation23_spill]] %s2664_s3 }
   0x4   :  { %8 = vsyncpa [#allocation5], 0 }
   0x5   :  { %10 = vsyncpa [#allocation5 + $0x1], 0 }
   0x6   :  { %11 = vsyncpa [#allocation8], 0 }
   0x7   :  { %12 = vsyncpa [#allocation6], 0 }
   0x8   :  { %14 = vsyncpa [#allocation6 + $0x1], 0  ;;  %s2160_s12 = smov 0   ;;  %s2162_s13 = smov 0  }
   0x9   :  { %s2164_s14 = smov 0   ;;  %s2166_s15 = smov 0  }
   0xa   :  { %s2168_s16 = smov 0   ;;  %s2170_s17 = smov 0  }
   0xb   :  { %s2172_s18 = smov 0   ;;  %s2174_s19 = smov 0  }
   0xc   :  { %s2176_s20 = smov 0   ;;  %s2178_s21 = smov 0  }
   0xd   :  { %s2180_s22 = smov 0   ;;  %s2182_s23 = smov 0  }
   0xe   :  { %s2184_s24 = smov 0  }
   0xf LB: > { %2685 = sst [smem:[#allocation14_spill]] %s2081_s12  ;;  %s1405_s25 = sadd.s32 4294967295, %s2129_s24   ;;  %s2129_s24 = sphi %s2184_s24, %s2732_s24   ;;  %s2125_s23 = sphi %s2182_s23, %s2731_s23   ;;  %s2121_s22 = sphi %s2180_s22, %s2730_s22   ;;  %s2117_s21 = sphi %s2178_s21, %s2729_s21   ;;  %s2113_s20 = sphi %s2176_s20, %s2717_s20   ;;  %s2109_s19 = sphi %s2174_s19, %s2728_s19   ;;  %s2105_s18 = sphi %s2172_s18, %s2727_s18   ;;  %s2101_s17 = sphi %s2170_s17, %s2726_s17   ;;  %s2097_s16 = sphi %s2168_s16, %s2725_s16   ;;  %s2093_s15 = sphi %s2166_s15, %s2724_s15   ;;  %s2089_s14 = sphi %s2164_s14, %s2723_s14   ;;  %s2085_s13 = sphi %s2162_s13, %s2722_s13   ;;  %s2081_s12 = sphi %s2160_s12, %s2721_s12  }
  0x10   : > { %2686 = sst [smem:[#allocation15_spill]] %s2125_s23  ;;  %p55_p0 = scmp.ne.s32.totalorder %s2101_s17, %s2097_s16 }
  0x11   : > { %2687 = sst [smem:[#allocation16_spill]] %s2129_s24  ;;  %p56_p1 = scmp.eq.s32.totalorder %s2129_s24, 0 }
  0x12   : > { %p61_p2 = scmp.ne.s32.totalorder %s2097_s16, %s2093_s15  ;;  %s1406_s26 = sadd.s32 4294967294, %s2129_s24  }
  0x13   : > { %p2229_p3 = scmp.eq.s32.totalorder %s1405_s25, 0  ;;  %p2233_p4 = por %p56_p1, %p55_p0 }
  0x14   : > { %p138_p5 = scmp.ne.s32.totalorder %s2089_s14, %s2085_s13  ;;  %p139_p7 = scmp.eq.s32.totalorder %s1405_s25, 31 }
  0x15   : > { %s2688_s27 = scalar_select %p2229_p3, 1, 0 }
  0x16   : > { %p2241_p6 = por %p2229_p3, %p61_p2  ;;  %p144_p8 = scmp.ne.s32.totalorder %s2085_s13, %s2081_s12 }
  0x17   : > { %p145_p9 = scmp.eq.s32.totalorder %s1406_s26, 31  ;;  %p2247_p10 = por %p139_p7, %p138_p5 }
  0x18   : > { %s2690_s29 = scalar_select %p2241_p6, 1, 0 }
  0x19   : > { %s2691_s30 = scalar_select %p2247_p10, 1, 0 }
  0x1a   : > { %p1409_p11 = scmp.ge.s32.totalorder %s2129_s24, 1  ;;  %p2252_p12 = por %p145_p9, %p144_p8 }
  0x1b   : > { %2692 = sst [smem:[#allocation17_spill]] %s2691_s30  ;;  %p152_p13 = scmp.lt.s32.totalorder %s2129_s24, 33 }
  0x1c   : > { %s2693_s4 = scalar_select %p2252_p12, 1, 0 }
  0x1d   : > { %p2257_p0 = pnand %p1409_p11, %p152_p13  ;;  %s2131_s6 = smov [#allocation7]  }
  0x1e   : > { %2694 = sst [smem:[#allocation18_spill]] %s2693_s4  ;;  %s164_s7 = sshll.u32 %s2131_s6, 4  ;;  %s2261_s7 = int_to_ptr.vmem [resolvable:$true] %s164_s7 }
  0x1f   : > { %s2695_s5 = scalar_select %p2257_p0, 1, 0 }
  0x20   : > { %p1713_p1 = pneg %p2257_p0  ;;  %p1730_p2 = scmp.lt.s32.totalorder %s2129_s24, 32 }
  0x21   : > { %s2132_s10 = smov [#allocation9]   ;;  %s2698_s1 = sld [smem:[#allocation21_spill]] }
  0x22   : > { %p2268_p5 = pnand %p1713_p1, %p2229_p3  ;;  %p2274_p7 = pnand %p1730_p2, %p2233_p4 }
  0x23   : > { %s177_s11 = sshll.u32 %s2132_s10, 4  ;;  %s2278_s11 = int_to_ptr.vmem [resolvable:$true] %s177_s11 }
  0x24   : > { %p1903_p9 = pneg %p2268_p5 }
  0x27   : > { %s1901_s26 = scalar_lea.hbm %s2698_s1, 4096 }
  0x28   : > { %p1902_p8 = scmp.ne.s32.totalorder %s2698_s1, %s1901_s26  ;;  %p1908_p13 = scmp.lt.u32.totalorder %s1901_s26, %s2698_s1 }
  0x2a   : > { %p1904_p4 = pnand %p1903_p9, %p1902_p8 }
  0x2c   : > { %p1905_p11 = pneg %p1904_p4 }
  0x2e   : > { %p1910_p1 = pnand %p1908_p13, %p1905_p11 }
  0x30   : > { %1913 = shalt.err (!%p1910_p1)
}
  0x31   : > { %s1914_s10 = scalar_lea.vmem %s2261_s7, 4096  ;;  %p1922_p3 = scmp.lt.s32.totalorder %s2261_s7, %s2261_s7 }
  0x32   : > { %p1915_p2 = scmp.ne.s32.totalorder %s2261_s7, %s1914_s10  ;;  %p1923_p8 = scmp.lt.s32.totalorder %s1914_s10, %s1914_s10 }
  0x34   : > { %p1917_p12 = pnand %p1915_p2, %p1903_p9  ;;  %p1924_p4 = por %p1923_p8, %p1922_p3 }
  0x36   : > { %p1918_p10 = pneg %p1917_p12 }
  0x38   : > { %p1925_p6 = pnand %p1924_p4, %p1918_p10 }
  0x3a   : > { %1928 = shalt.err (!%p1925_p6)
}
  0x3b   : > { %s2676_s12 = smov 64   ;;  %s2677_s4 = smov 4  }
  0x3c   : > { %1716 = dma.hbm_to_vmem [thread:$0]  (!%p2268_p5), %s2698_s1, 4096, %s2261_s7, [#allocation8], %s2676_s12, %s2676_s12, %s2677_s4  }
  0x3d   : > { %s2699_s2 = sld [smem:[#allocation22_spill]] }
  0x43   : > { %s1929_s28 = scalar_lea.hbm %s2699_s2, 3072 }
  0x44   : > { %p1930_p3 = scmp.ne.s32.totalorder %s2699_s2, %s1929_s28  ;;  %p1936_p12 = scmp.lt.u32.totalorder %s1929_s28, %s2699_s2 }
  0x46   : > { %p1932_p6 = pnand %p1930_p3, %p1903_p9 }
  0x48   : > { %p1933_p10 = pneg %p1932_p6 }
  0x4a   : > { %p1938_p11 = pnand %p1936_p12, %p1933_p10 }
  0x4c   : > { %1941 = shalt.err (!%p1938_p11)
}
  0x4d   : > { %s1942_s7 = scalar_lea.vmem %s2278_s11, 3072  ;;  %p1950_p8 = scmp.lt.s32.totalorder %s2278_s11, %s2278_s11 }
  0x4e   : > { %p1943_p13 = scmp.ne.s32.totalorder %s2278_s11, %s1942_s7  ;;  %p1951_p4 = scmp.lt.s32.totalorder %s1942_s7, %s1942_s7 }
  0x50   : > { %p1945_p1 = pnand %p1943_p13, %p1903_p9  ;;  %p1952_p3 = por %p1951_p4, %p1950_p8 }
  0x52   : > { %p1946_p2 = pneg %p1945_p1 }
  0x54   : > { %p1953_p6 = pnand %p1952_p3, %p1946_p2 }
  0x56   : > { %1956 = shalt.err (!%p1953_p6)
}
  0x57   : > { %1719 = dma.hbm_to_vmem [thread:$0]  (!%p2268_p5), %s2699_s2, 3072, %s2278_s11, [#allocation8], %s2676_s12, %s2676_s12, %s2677_s4  }
  0x58   : > { %s48_s30 = sadd.s32 1, %s2101_s17  ;;  %s32_s8 = sadd.s32 1, %s2117_s21 }
  0x59   : > { %s35_s15 = sadd.s32 1, %s2121_s22  ;;  %p33_p9 = scmp.ge.s32.totalorder %s32_s8, 4 }
  0x5a   : > { %p113_p10 = scmp.eq.s32.totalorder %s2125_s23, 1  ;;  %s39_s25 = sadd.s32 1, %s2125_s23 }
  0x5b   : > { %p114_p12 = scmp.eq.s32.totalorder %s2117_s21, 3  ;;  %s2734_s8 = smov (%p33_p9, %s32_s8), 0 }
  0x5c   : > { %2700 = sst [smem:[#allocation19_spill]] %s2734_s8  ;;  %s2736_s15 = smov (!%p33_p9, %s35_s15), %s2121_s22 }
  0x5d   : > { %p2347_p11 = pnand %p114_p12, %p113_p10  ;;  %s191_s11 = sand.u32 1, %s2101_s17  }
  0x5e   : > { %p37_p5 = scmp.ge.s32.totalorder %s2736_s15, 4  ;;  %s44_s6 = ssub.s32 %s2117_s21, %s2734_s8 }
  0x5f   : > { %s1407_s28 = scalar_select %p2347_p11, %s2125_s23, 2 }
  0x60   : > { %s2738_s15 = smov (%p37_p5, %s2736_s15), 0  ;;  %s2740_s25 = smov (!%p37_p5, %s39_s25), %s2125_s23 }
  0x61   : > { %2702 = sst [smem:[#allocation20_spill]] %s2738_s15  ;;  %s43_s10 = ssub.s32 %s2121_s22, %s2738_s15 }
  0x62   : > { %p119_p13 = scmp.eq.s32.totalorder %s2734_s8, 3  ;;  %p41_p1 = scmp.ge.s32.totalorder %s2740_s25, 2 }
  0x63   : > { %s45_s7 = sor.u32 %s44_s6, %s43_s10  ;;  %s1413_s3 = sshll.u32 %s191_s11, 6 }
  0x64   : > { %p46_p2 = scmp.eq.s32.totalorder %s45_s7, 0  ;;  %s2742_s25 = smov (%p41_p1, %s2740_s25), 0 }
  0x65   : > { %p118_p8 = scmp.eq.s32.totalorder %s2742_s25, 1  ;;  %s1507_s26 = sshll.u32 %s2121_s22, 6 }
  0x66   : > { %s2366_s24 = scalar_select %p46_p2, %s2101_s17, %s48_s30  }
  0x67   : > { %s195_s12 = scalar_lea.vmem [#allocation4], %s1413_s3  ;;  %p120_p4 = pnand %p119_p13, %p118_p8 }
  0x68   : > { %s204_s4 = sshll.u32 %s195_s12, 4  ;;  %s201_s1 = sadd.s32 %s2117_s21, %s1507_s26  ;;  %s2377_s4 = int_to_ptr.vmem [resolvable:$true] %s204_s4 }
  0x69   : > { %s1416_s2 = sshll.u32 %s201_s1, 6  ;;  %s128_s23 = sadd.s32 1, %s2089_s14 }
  0x6a   : > { %s1408_s15 = scalar_select %p120_p4, %s2742_s25, 2 }
  0x6b   : > { %s2375_s7 = scalar_lea.hbm %s2661_s0, %s1416_s2  ;;  %s2384_s1 = scalar_lea.sflag [#allocation5], %s191_s11 }
  0x6c   : > { %s123_s30 = ssub.s32 %s1407_s28, %s1408_s15  ;;  %s1957_s26 = scalar_lea.hbm %s2375_s7, 1024 }
  0x6d   : > { %s125_s3 = sor.u32 %s123_s30, %s43_s10  ;;  %p1958_p6 = scmp.ne.s32.totalorder %s2375_s7, %s1957_s26 }
  0x6e   : > { %p2380_p3 = scmp.eq.s32.totalorder %s125_s3, 0  ;;  %p1959_p9 = pneg %p2274_p7 }
  0x6f   : > { %s1962_s15 = scalar_lea.hbm %s2661_s0, 16384  ;;  %p1963_p11 = scmp.lt.u32.totalorder %s2375_s7, %s2661_s0 }
  0x70   : > { %p1960_p10 = pnand %p1959_p9, %p1958_p6  ;;  %p1964_p5 = scmp.lt.u32.totalorder %s1962_s15, %s1957_s26 }
  0x71   : > { %p1966_p1 = scmp.lt.u32.totalorder %s1957_s26, %s2375_s7 }
  0x72   : > { %p1961_p12 = pneg %p1960_p10  ;;  %p1965_p13 = por %p1964_p5, %p1963_p11 }
  0x74   : > { %p1967_p2 = por %p1966_p1, %p1965_p13 }
  0x76   : > { %p1968_p8 = pnand %p1967_p2, %p1961_p12 }
  0x78   : > { %1971 = shalt.err (!%p1968_p8)
}
  0x79   : > { %s1972_s11 = scalar_lea.vmem %s2377_s4, 1024  ;;  %s2135_s6 = smov [#allocation4]  }
  0x7a   : > { %p1973_p4 = scmp.ne.s32.totalorder %s2377_s4, %s1972_s11  ;;  %s1977_s30 = sshll.u32 %s2135_s6, 4  ;;  %s1978_s30 = int_to_ptr.vmem [resolvable:$false] %s1977_s30 }
  0x7b   : > { %s1979_s3 = scalar_lea.vmem %s1978_s30, 2048  ;;  %p1980_p0 = scmp.lt.s32.totalorder %s2377_s4, %s1978_s30 }
  0x7c   : > { %p1975_p6 = pnand %p1973_p4, %p1959_p9  ;;  %p1981_p11 = scmp.lt.s32.totalorder %s1979_s3, %s1972_s11 }
  0x7e   : > { %p1976_p10 = pneg %p1975_p6  ;;  %p1982_p5 = por %p1981_p11, %p1980_p0 }
  0x80   : > { %p1983_p13 = pnand %p1982_p5, %p1976_p10 }
  0x82   : > { %1986 = shalt.err (!%p1983_p13)
}
  0x83   : > { %s2136_s26 = smov 256   ;;  %s2704_s2 = smov 4  }
  0x84   : > { %s2705_s8 = smov 64   ;;  %p2706_p0 = scmp.ne.s32.totalorder %s2695_s5, 0 }
  0x85   : > { %1723 = dma.hbm_to_vmem [thread:$0]  (!%p2274_p7), %s2375_s7, 1024, %s2377_s4, %s2384_s1, %s2136_s26, %s2705_s8, %s2704_s2  }
  0x86   : > { %s2419_s15 = scalar_select %p2380_p3, %s2089_s14, %s128_s23  }
  0x87   : > { %216 = sbr.rel (%p2706_p0) target bundleno = 1019 (0x3fb), region = 32  ;;  %s218_s28 = sand.u32 (!%p2706_p0), 1, %s2097_s16  }
  0x88   : > { %s1418_s9 = sshll.u32 (!%p2706_p0), %s218_s28, 6  ;;  %s219_s10 = scalar_lea.sflag (!%p2706_p0), [#allocation5], %s218_s28 }
  0x89   : > { %s2424_s11 = scalar_lea.vmem (!%p2706_p0), [#allocation4], %s1418_s9  ;;  %p2707_p9 = scmp.ne.s32.totalorder (!%p2706_p0), %s2690_s29, 0 }
  0x8e   : > { %2068 = dma.done.wait (%p2707_p9), %s219_s10, 1024  }
  0x8f   : > { %2070 = vsyncadd (%p2707_p9), %s219_s10, 4294966272  ;;  %p2708_p7 = scmp.ne.s32.totalorder %s2688_s27, 0 }
  0x91   : > { %2072 = dma.done.wait (%p2708_p7), [#allocation8], 7168  }
  0x92   : > { %2074 = vsyncadd (%p2708_p7), [#allocation8], 4294960128  ;;  %s250_s23 = sand.u32 1, %s2085_s13   ;;  %p261_p3 = scmp.lt.s32.totalorder %s2113_s20, 0 }
  0x93   : > { %s1421_s5 = sshll.u32 %s250_s23, 7  ;;  %s262_s29 = ssub.s32 0, %s2113_s20 }
  0x94   : > { %s1422_s4 = smin.u32 %s2113_s20, %s262_s29  ;;  %s273_s12 = sadd.s32 1, %s2113_s20 }
  0x95   : > { %s264_s7 = sand.u32 1, %s1422_s4   ;;  %p274_p12 = scmp.lt.s32.totalorder %s273_s12, 0 }
  0x96   : > { %s265_s1 = ssub.s32 0, %s264_s7  ;;  %s275_s27 = ssub.s32 0, %s273_s12 }
  0x97   : > { %s2744_s1 = smov (!%p261_p3, %s265_s1), %s264_s7  ;;  %p286_p1 = scmp.eq.s32.totalorder %s2113_s20, 0 }
  0x98   : > { %p1424_p2 = scmp.lt.s32.totalorder %s2744_s1, 0  ;;  %s271_s6 = sadd.s32 2, %s2744_s1 }
  0x99   : > { %s1425_s30 = smin.u32 %s275_s27, %s273_s12  ;;  %p287_p8 = scmp.eq.s32.totalorder %s2109_s19, 0 }
  0x9a   : > { %s2746_s6 = smov (!%p1424_p2, %s271_s6), %s2744_s1  ;;  %s277_s3 = sand.u32 1, %s1425_s30  }
  0x9b   : > { %p288_p4 = pnand %p287_p8, %p286_p1  ;;  %s278_s26 = ssub.s32 0, %s277_s3 }
  0x9c   : > { %p290_p6 = scmp.eq.s32.totalorder %s2105_s18, 0  ;;  %s2748_s26 = smov (!%p274_p12, %s278_s26), %s277_s3 }
  0x9d   : > { %p289_p10 = pneg %p288_p4  ;;  %p1427_p11 = scmp.lt.s32.totalorder %s2748_s26, 0 }
  0x9e   : > { %s284_s2 = sadd.s32 2, %s2748_s26  ;;  %s2450_s8 = scalar_lea.vmem [#allocation10], %s1421_s5 }
  0x9f   : > { %p291_p5 = pnand %p290_p6, %p289_p10  ;;  %s2750_s2 = smov (!%p1427_p11, %s284_s2), %s2748_s26 }
  0xa0   : > { %v1845_v0 = vld [vmem:[#allocation7] sm:$0xff] (!%p291_p5)   ;;  %v1846_v1 = vld [vmem:[#allocation7 + $0x8] sm:$0xff] (!%p291_p5)   ;;  %v1847_v2 = vld [vmem:[#allocation7 + $0x10] sm:$0xff] (!%p291_p5)  }
  0xa1   : > { %294 = sbr.rel (%p291_p5) target bundleno = 177 (0xb1), region = 48  ;;  %551 = vst [vmem:[#allocation2] sm:$0xff] (!%p291_p5), %v1845_v0  ;;  %552 = vst [vmem:[#allocation2 + $0x8] sm:$0xff] (!%p291_p5), %v1846_v1  ;;  %v1848_v3 = vld [vmem:[#allocation7 + $0x18] sm:$0xff] (!%p291_p5)   ;;  %v1849_v4 = vld [vmem:[#allocation7 + $0x20] sm:$0xff] (!%p291_p5)  }
  0xa2   : > { %553 = vst [vmem:[#allocation2 + $0x10] sm:$0xff] (!%p291_p5), %v1847_v2  ;;  %554 = vst [vmem:[#allocation2 + $0x18] sm:$0xff] (!%p291_p5), %v1848_v3  ;;  %v1850_v5 = vld [vmem:[#allocation7 + $0x28] sm:$0xff] (!%p291_p5)   ;;  %v1851_v6 = vld [vmem:[#allocation7 + $0x30] sm:$0xff] (!%p291_p5)  }
  0xa3   : > { %555 = vst [vmem:[#allocation2 + $0x20] sm:$0xff] (!%p291_p5), %v1849_v4  ;;  %556 = vst [vmem:[#allocation2 + $0x28] sm:$0xff] (!%p291_p5), %v1850_v5  ;;  %v1852_v7 = vld [vmem:[#allocation7 + $0x38] sm:$0xff] (!%p291_p5)   ;;  %v1853_v8 = vld [vmem:[#allocation7 + $0x40] sm:$0xff] (!%p291_p5)  }
  0xa4   : > { %557 = vst [vmem:[#allocation2 + $0x30] sm:$0xff] (!%p291_p5), %v1851_v6  ;;  %558 = vst [vmem:[#allocation2 + $0x38] sm:$0xff] (!%p291_p5), %v1852_v7  ;;  %v1854_v9 = vld [vmem:[#allocation7 + $0x48] sm:$0xff] (!%p291_p5)   ;;  %v1855_v10 = vld [vmem:[#allocation7 + $0x50] sm:$0xff] (!%p291_p5)  }
  0xa5   : > { %559 = vst [vmem:[#allocation2 + $0x40] sm:$0xff] (!%p291_p5), %v1853_v8  ;;  %560 = vst [vmem:[#allocation2 + $0x48] sm:$0xff] (!%p291_p5), %v1854_v9  ;;  %v1856_v11 = vld [vmem:[#allocation7 + $0x58] sm:$0xff] (!%p291_p5)   ;;  %v1857_v12 = vld [vmem:[#allocation7 + $0x60] sm:$0xff] (!%p291_p5)  }
  0xa6   : > { %561 = vst [vmem:[#allocation2 + $0x50] sm:$0xff] (!%p291_p5), %v1855_v10  ;;  %562 = vst [vmem:[#allocation2 + $0x58] sm:$0xff] (!%p291_p5), %v1856_v11  ;;  %v1858_v13 = vld [vmem:[#allocation7 + $0x68] sm:$0xff] (!%p291_p5)   ;;  %v1859_v14 = vld [vmem:[#allocation7 + $0x70] sm:$0xff] (!%p291_p5)  }
  0xa7   : > { %563 = vst [vmem:[#allocation2 + $0x60] sm:$0xff] (!%p291_p5), %v1857_v12  ;;  %564 = vst [vmem:[#allocation2 + $0x68] sm:$0xff] (!%p291_p5), %v1858_v13  ;;  %v1860_v15 = vld [vmem:[#allocation7 + $0x78] sm:$0xff] (!%p291_p5)   ;;  %v1861_v16 = vld [vmem:[#allocation7 + $0x80] sm:$0xff] (!%p291_p5)  }
  0xa8   : > { %565 = vst [vmem:[#allocation2 + $0x70] sm:$0xff] %v1859_v14  ;;  %566 = vst [vmem:[#allocation2 + $0x78] sm:$0xff] %v1860_v15  ;;  %v1862_v17 = vld [vmem:[#allocation7 + $0x88] sm:$0xff]   ;;  %v1863_v18 = vld [vmem:[#allocation7 + $0x90] sm:$0xff]  }
  0xa9   : > { %567 = vst [vmem:[#allocation2 + $0x80] sm:$0xff] %v1861_v16  ;;  %568 = vst [vmem:[#allocation2 + $0x88] sm:$0xff] %v1862_v17  ;;  %v1864_v19 = vld [vmem:[#allocation7 + $0x98] sm:$0xff]   ;;  %v1865_v20 = vld [vmem:[#allocation7 + $0xa0] sm:$0xff]  }
  0xaa   : > { %569 = vst [vmem:[#allocation2 + $0x90] sm:$0xff] %v1863_v18  ;;  %570 = vst [vmem:[#allocation2 + $0x98] sm:$0xff] %v1864_v19  ;;  %v1866_v21 = vld [vmem:[#allocation7 + $0xa8] sm:$0xff]   ;;  %v1867_v22 = vld [vmem:[#allocation7 + $0xb0] sm:$0xff]  }
  0xab   : > { %571 = vst [vmem:[#allocation2 + $0xa0] sm:$0xff] %v1865_v20  ;;  %572 = vst [vmem:[#allocation2 + $0xa8] sm:$0xff] %v1866_v21  ;;  %v1868_v23 = vld [vmem:[#allocation7 + $0xb8] sm:$0xff]   ;;  %v1869_v24 = vld [vmem:[#allocation7 + $0xc0] sm:$0xff]  }
  0xac   : > { %573 = vst [vmem:[#allocation2 + $0xb0] sm:$0xff] %v1867_v22  ;;  %574 = vst [vmem:[#allocation2 + $0xb8] sm:$0xff] %v1868_v23  ;;  %v1870_v25 = vld [vmem:[#allocation7 + $0xc8] sm:$0xff]   ;;  %v1871_v26 = vld [vmem:[#allocation7 + $0xd0] sm:$0xff]  }
  0xad   : > { %575 = vst [vmem:[#allocation2 + $0xc0] sm:$0xff] %v1869_v24  ;;  %576 = vst [vmem:[#allocation2 + $0xc8] sm:$0xff] %v1870_v25  ;;  %v1872_v27 = vld [vmem:[#allocation7 + $0xd8] sm:$0xff]   ;;  %v1873_v28 = vld [vmem:[#allocation7 + $0xe0] sm:$0xff]  }
  0xae   : > { %577 = vst [vmem:[#allocation2 + $0xd0] sm:$0xff] %v1871_v26  ;;  %578 = vst [vmem:[#allocation2 + $0xd8] sm:$0xff] %v1872_v27  ;;  %v1874_v29 = vld [vmem:[#allocation7 + $0xe8] sm:$0xff]   ;;  %v1875_v30 = vld [vmem:[#allocation7 + $0xf0] sm:$0xff]  }
  0xaf   : > { %579 = vst [vmem:[#allocation2 + $0xe0] sm:$0xff] %v1873_v28  ;;  %580 = vst [vmem:[#allocation2 + $0xe8] sm:$0xff] %v1874_v29  ;;  %v1876_v31 = vld [vmem:[#allocation7 + $0xf8] sm:$0xff]  }
  0xb0   : > { %581 = vst [vmem:[#allocation2 + $0xf0] sm:$0xff] %v1875_v30  ;;  %582 = vst [vmem:[#allocation2 + $0xf8] sm:$0xff] %v1876_v31 }
  0xb1 PF: > { %s1460_s28 = sshll.u32 %s2109_s19, 7  ;;  %p1461_p13 = scmp.ne.s32.totalorder %s2105_s18, 0 }
  0xb2   : > { %s1508_s9 = sshll.u32 (!%p1461_p13), %s2113_s20, 6  ;;  %s587_s10 = sshra.s32 (!%p1461_p13), %s1460_s28, 4 }
  0xb3   : > { %586 = sbr.rel (%p1461_p13) target bundleno = 438 (0x1b6), region = 52  ;;  %s1462_s5 = sshll.u32 (!%p1461_p13), %s2746_s6, 5 }
  0xb4   : > { %s2460_s29 = scalar_lea.vmem (!%p1461_p13), [#allocation9], %s1508_s9  ;;  %s590_s4 = sadd.s32 (!%p1461_p13), %s1462_s5, %s587_s10 }
  0xb5   : > { %v1877_v32 = vld [vmem:[%s2460_s29] sm:$0xff] (!%p1461_p13)   ;;  %v1878_v33 = vld [vmem:[%s2460_s29 + $0x8] sm:$0xff] (!%p1461_p13)   ;;  %s1463_s7 = sshll.u32 (!%p1461_p13), %s590_s4, 3  ;;  %v1879_v34 = vld [vmem:[%s2460_s29 + $0x10] sm:$0xff] (!%p1461_p13)  }
  0xb6   : > { %1557 = vmatprep.subr.bf16.mxu0 (!%p1461_p13), %v1877_v32  ;;  %1653 = vmatprep.subr.bf16.mxu1 (!%p1461_p13), %v1877_v32  ;;  %v1880_v35 = vld [vmem:[%s2460_s29 + $0x18] sm:$0xff] (!%p1461_p13)   ;;  %s2466_s12 = scalar_lea.vmem (!%p1461_p13), [#allocation2], %s1463_s7  ;;  %v1881_v38 = vld [vmem:[%s2460_s29 + $0x20] sm:$0xff] (!%p1461_p13)   ;;  %v1882_v39 = vld [vmem:[%s2460_s29 + $0x28] sm:$0xff] (!%p1461_p13)  }
  0xb7   : > { %1558 = vmatpush3.bf16.msra.mxu0 (!%p1461_p13), %v1877_v32  ;;  %1661 = vmatpush3.bf16.msra.mxu1 (!%p1461_p13), %v1877_v32  ;;  %v593_v36 = vld [vmem:[%s2466_s12] sm:$0xff] (!%p1461_p13)  ;;  %v1883_v40 = vld [vmem:[%s2460_s29 + $0x30] sm:$0xff] (!%p1461_p13)   ;;  %v1884_v41 = vld [vmem:[%s2460_s29 + $0x38] sm:$0xff] (!%p1461_p13)  }
  0xb8   : > { %1559 = vmatprep.subr.bf16.mxu0 (!%p1461_p13), %v1878_v33  ;;  %1654 = vmatprep.subr.bf16.mxu1 (!%p1461_p13), %v1878_v33  ;;  %v597_v37 = vld [vmem:[%s2466_s12 + $0x20] sm:$0xff] (!%p1461_p13)  ;;  %v594_v42 = vld [vmem:[%s2466_s12 + $0x8] sm:$0xff] (!%p1461_p13)  ;;  %v595_v44 = vld [vmem:[%s2466_s12 + $0x10] sm:$0xff] (!%p1461_p13) }
  0xb9   : > { %1573 = vmatprep.mubr.bf16.mxu0 (!%p1461_p13), %v593_v36  ;;  %1581 = vmatprep.mubr.bf16.mxu1 (!%p1461_p13), %v597_v37  ;;  %v598_v43 = vld [vmem:[%s2466_s12 + $0x28] sm:$0xff] (!%p1461_p13)  ;;  %v599_v45 = vld [vmem:[%s2466_s12 + $0x30] sm:$0xff] (!%p1461_p13)  ;;  %v596_v46 = vld [vmem:[%s2466_s12 + $0x18] sm:$0xff] (!%p1461_p13) }
  0xba   : > { %v600_v47 = vld [vmem:[%s2466_s12 + $0x38] sm:$0xff] }
  0xbb   : > { %1560 = vmatpush3.bf16.msra.mxu0 %v1878_v33  ;;  %1662 = vmatpush3.bf16.msra.mxu1 %v1878_v33 }
  0xbc   : > { %1561 = vmatprep.subr.bf16.mxu0 %v1879_v34  ;;  %1655 = vmatprep.subr.bf16.mxu1 %v1879_v34 }
  0xbf   : > { %1562 = vmatpush3.bf16.msra.mxu0 %v1879_v34  ;;  %1663 = vmatpush3.bf16.msra.mxu1 %v1879_v34 }
  0xc0   : > { %1563 = vmatprep.subr.bf16.mxu0 %v1880_v35  ;;  %1656 = vmatprep.subr.bf16.mxu1 %v1880_v35 }
  0xc3   : > { %1564 = vmatpush3.bf16.msra.mxu0 %v1880_v35  ;;  %1664 = vmatpush3.bf16.msra.mxu1 %v1880_v35 }
  0xc4   : > { %1565 = vmatprep.subr.bf16.mxu0 %v1881_v38  ;;  %1657 = vmatprep.subr.bf16.mxu1 %v1881_v38 }
  0xc7   : > { %1566 = vmatpush3.bf16.msra.mxu0 %v1881_v38  ;;  %1665 = vmatpush3.bf16.msra.mxu1 %v1881_v38 }
  0xc8   : > { %1567 = vmatprep.subr.bf16.mxu0 %v1882_v39  ;;  %1658 = vmatprep.subr.bf16.mxu1 %v1882_v39 }
  0xcb   : > { %1568 = vmatpush3.bf16.msra.mxu0 %v1882_v39  ;;  %1666 = vmatpush3.bf16.msra.mxu1 %v1882_v39 }
  0xcc   : > { %1569 = vmatprep.subr.bf16.mxu0 %v1883_v40  ;;  %1659 = vmatprep.subr.bf16.mxu1 %v1883_v40 }
  0xcf   : > { %1570 = vmatpush3.bf16.msra.mxu0 %v1883_v40  ;;  %1667 = vmatpush3.bf16.msra.mxu1 %v1883_v40 }
  0xd0   : > { %1571 = vmatprep.subr.bf16.mxu0 %v1884_v41  ;;  %1660 = vmatprep.subr.bf16.mxu1 %v1884_v41 }
  0xd3   : > { %1572 = vmatpush3.bf16.msra.mxu0 %v1884_v41  ;;  %1668 = vmatpush3.bf16.msra.mxu1 %v1884_v41 }
  0xd6   : > { %1574 = vmatmul.mubr.bf16.vlgmr.msra.gmra.mrb[0].mxu0 %v594_v42  ;;  %1582 = vmatmul.mubr.bf16.vlgmr.msra.gmra.mrb[0].mxu1 %v598_v43 }
  0xd7   : > { %1577 = vmatprep.mubr.bf16.mxu0 %v595_v44  ;;  %1585 = vmatprep.mubr.bf16.mxu1 %v599_v45 }
  0xde   : > { %1578 = vmatmul.mubr.bf16.gmra.mrb[4].mxu0 %v596_v46  ;;  %1586 = vmatmul.mubr.bf16.gmra.mrb[4].mxu1 %v600_v47 }
 0x1a9   : > { %v1575_v48 = vpop.f32.mrb[0].mxu0  ;;  %v1583_v49 = vpop.f32.mrb[0].mxu1 }
 0x1aa   : > { %767 = vst [vmem:[%s2450_s8 + $0x10] sm:$0xff] %v1575_v48  ;;  %775 = vst [vmem:[%s2450_s8 + $0x50] sm:$0xff] %v1583_v49  ;;  %v702_v50 = vpop.f32.mrb[1].mxu0  ;;  %v734_v51 = vpop.f32.mrb[1].mxu1 }
 0x1ab   : > { %765 = vst [vmem:[%s2450_s8] sm:$0xff] %v702_v50  ;;  %773 = vst [vmem:[%s2450_s8 + $0x40] sm:$0xff] %v734_v51  ;;  %v1576_v52 = vpop.f32.mrb[2].mxu0  ;;  %v1584_v53 = vpop.f32.mrb[2].mxu1 }
 0x1ac   : > { %768 = vst [vmem:[%s2450_s8 + $0x18] sm:$0xff] %v1576_v52  ;;  %776 = vst [vmem:[%s2450_s8 + $0x58] sm:$0xff] %v1584_v53  ;;  %v705_v54 = vpop.f32.mrb[3].mxu0  ;;  %v737_v55 = vpop.f32.mrb[3].mxu1 }
 0x1ad   : > { %766 = vst [vmem:[%s2450_s8 + $0x8] sm:$0xff] %v705_v54  ;;  %774 = vst [vmem:[%s2450_s8 + $0x48] sm:$0xff] %v737_v55 }
 0x1b1   : > { %v1579_v56 = vpop.f32.mrb[4].mxu0  ;;  %v1587_v57 = vpop.f32.mrb[4].mxu1 }
 0x1b2   : > { %771 = vst [vmem:[%s2450_s8 + $0x30] sm:$0xff] %v1579_v56  ;;  %779 = vst [vmem:[%s2450_s8 + $0x70] sm:$0xff] %v1587_v57  ;;  %v718_v58 = vpop.f32.mrb[5].mxu0  ;;  %v750_v59 = vpop.f32.mrb[5].mxu1 }
 0x1b3   : > { %769 = vst [vmem:[%s2450_s8 + $0x20] sm:$0xff] %v718_v58  ;;  %777 = vst [vmem:[%s2450_s8 + $0x60] sm:$0xff] %v750_v59  ;;  %v1580_v60 = vpop.f32.mrb[6].mxu0  ;;  %v1588_v61 = vpop.f32.mrb[6].mxu1 }
 0x1b4   : > { %772 = vst [vmem:[%s2450_s8 + $0x38] sm:$0xff] %v1580_v60  ;;  %780 = vst [vmem:[%s2450_s8 + $0x78] sm:$0xff] %v1588_v61  ;;  %v721_v62 = vpop.f32.mrb[7].mxu0  ;;  %v753_v63 = vpop.f32.mrb[7].mxu1 }
 0x1b5   : > { %770 = vst [vmem:[%s2450_s8 + $0x28] sm:$0xff] %v721_v62  ;;  %778 = vst [vmem:[%s2450_s8 + $0x68] sm:$0xff] %v753_v63 }
 0x1b6 PF: > { %s1474_s1 = sshll.u32 %s2105_s18, 7  ;;  %s1475_s27 = sshll.u32 %s2746_s6, 5  ;;  %v1885_v0 = vld [vmem:[%s2424_s11] sm:$0xff]   ;;  %v1887_v10 = vld [vmem:[%s2424_s11 + $0x8] sm:$0xff]   ;;  %v1889_v12 = vld [vmem:[%s2424_s11 + $0x10] sm:$0xff]  }
 0x1b7   : > { %s782_s30 = sshra.s32 %s1474_s1, 4  ;;  %v1886_v1 = vld [vmem:[%s2424_s11 + $0x20] sm:$0xff]   ;;  %1605 = vmatprep.mubr.bf16.mxu0 %v1885_v0  ;;  %v1888_v11 = vld [vmem:[%s2424_s11 + $0x28] sm:$0xff]   ;;  %v1890_v13 = vld [vmem:[%s2424_s11 + $0x30] sm:$0xff]  }
 0x1b8   : > { %s785_s3 = sadd.s32 %s1475_s27, %s782_s30  ;;  %1613 = vmatprep.mubr.bf16.mxu1 %v1886_v1  ;;  %v1891_v14 = vld [vmem:[%s2424_s11 + $0x18] sm:$0xff]  }
 0x1b9   : > { %s1476_s26 = sshll.u32 %s785_s3, 3  ;;  %v1892_v15 = vld [vmem:[%s2424_s11 + $0x38] sm:$0xff]  }
 0x1ba   : > { %s2500_s9 = scalar_lea.vmem [#allocation2], %s1476_s26 }
 0x1bb   : > { %v788_v2 = vld [vmem:[%s2500_s9] sm:$0xff]  ;;  %v789_v3 = vld [vmem:[%s2500_s9 + $0x8] sm:$0xff]  ;;  %v790_v4 = vld [vmem:[%s2500_s9 + $0x10] sm:$0xff] }
 0x1bc   : > { %1589 = vmatprep.subr.bf16.mxu0 %v788_v2  ;;  %1669 = vmatprep.subr.bf16.mxu1 %v788_v2  ;;  %v791_v5 = vld [vmem:[%s2500_s9 + $0x18] sm:$0xff]  ;;  %v792_v6 = vld [vmem:[%s2500_s9 + $0x20] sm:$0xff]  ;;  %v793_v7 = vld [vmem:[%s2500_s9 + $0x28] sm:$0xff] }
 0x1bd   : > { %1590 = vmatpush3.bf16.msra.mxu0 %v788_v2  ;;  %1677 = vmatpush3.bf16.msra.mxu1 %v788_v2  ;;  %v794_v8 = vld [vmem:[%s2500_s9 + $0x30] sm:$0xff]  ;;  %v795_v9 = vld [vmem:[%s2500_s9 + $0x38] sm:$0xff] }
 0x1be   : > { %1591 = vmatprep.subr.bf16.mxu0 %v789_v3  ;;  %1670 = vmatprep.subr.bf16.mxu1 %v789_v3 }
 0x1c1   : > { %1592 = vmatpush3.bf16.msra.mxu0 %v789_v3  ;;  %1678 = vmatpush3.bf16.msra.mxu1 %v789_v3 }
 0x1c2   : > { %1593 = vmatprep.subr.bf16.mxu0 %v790_v4  ;;  %1671 = vmatprep.subr.bf16.mxu1 %v790_v4 }
 0x1c5   : > { %1594 = vmatpush3.bf16.msra.mxu0 %v790_v4  ;;  %1679 = vmatpush3.bf16.msra.mxu1 %v790_v4 }
 0x1c6   : > { %1595 = vmatprep.subr.bf16.mxu0 %v791_v5  ;;  %1672 = vmatprep.subr.bf16.mxu1 %v791_v5 }
 0x1c9   : > { %1596 = vmatpush3.bf16.msra.mxu0 %v791_v5  ;;  %1680 = vmatpush3.bf16.msra.mxu1 %v791_v5 }
 0x1ca   : > { %1597 = vmatprep.subr.bf16.mxu0 %v792_v6  ;;  %1673 = vmatprep.subr.bf16.mxu1 %v792_v6 }
 0x1cd   : > { %1598 = vmatpush3.bf16.msra.mxu0 %v792_v6  ;;  %1681 = vmatpush3.bf16.msra.mxu1 %v792_v6 }
 0x1ce   : > { %1599 = vmatprep.subr.bf16.mxu0 %v793_v7  ;;  %1674 = vmatprep.subr.bf16.mxu1 %v793_v7 }
 0x1d1   : > { %1600 = vmatpush3.bf16.msra.mxu0 %v793_v7  ;;  %1682 = vmatpush3.bf16.msra.mxu1 %v793_v7 }
 0x1d2   : > { %1601 = vmatprep.subr.bf16.mxu0 %v794_v8  ;;  %1675 = vmatprep.subr.bf16.mxu1 %v794_v8 }
 0x1d5   : > { %1602 = vmatpush3.bf16.msra.mxu0 %v794_v8  ;;  %1683 = vmatpush3.bf16.msra.mxu1 %v794_v8 }
 0x1d6   : > { %1603 = vmatprep.subr.bf16.mxu0 %v795_v9  ;;  %1676 = vmatprep.subr.bf16.mxu1 %v795_v9 }
 0x1d9   : > { %1604 = vmatpush3.bf16.msra.mxu0 %v795_v9  ;;  %1684 = vmatpush3.bf16.msra.mxu1 %v795_v9 }
 0x1dc   : > { %1606 = vmatmul.mubr.bf16.vlgmr.msra.gmra.mrb[0].mxu0 %v1887_v10  ;;  %1614 = vmatmul.mubr.bf16.vlgmr.msra.gmra.mrb[0].mxu1 %v1888_v11 }
 0x1dd   : > { %1609 = vmatprep.mubr.bf16.mxu0 %v1889_v12  ;;  %1617 = vmatprep.mubr.bf16.mxu1 %v1890_v13 }
 0x1e4   : > { %1610 = vmatmul.mubr.bf16.gmra.mrb[4].mxu0 %v1891_v14  ;;  %1618 = vmatmul.mubr.bf16.gmra.mrb[4].mxu1 %v1892_v15 }
 0x2af   : > { %v1607_v16 = vpop.f32.mrb[0].mxu0  ;;  %v1615_v17 = vpop.f32.mrb[0].mxu1 }
 0x2b0   : > { %v894_v18 = vpop.f32.mrb[1].mxu0  ;;  %v926_v19 = vpop.f32.mrb[1].mxu1  ;;  %962 = vst [vmem:[#allocation3 + $0x10] sm:$0xff] (!%p1461_p13), %v1607_v16  ;;  %970 = vst [vmem:[#allocation3 + $0x50] sm:$0xff] (!%p1461_p13), %v1615_v17 }
 0x2b1   : > { %v1608_v20 = vpop.f32.mrb[2].mxu0  ;;  %v1616_v21 = vpop.f32.mrb[2].mxu1  ;;  %960 = vst [vmem:[#allocation3] sm:$0xff] (!%p1461_p13), %v894_v18  ;;  %968 = vst [vmem:[#allocation3 + $0x40] sm:$0xff] (!%p1461_p13), %v926_v19 }
 0x2b2   : > { %v897_v22 = vpop.f32.mrb[3].mxu0  ;;  %v929_v23 = vpop.f32.mrb[3].mxu1  ;;  %963 = vst [vmem:[#allocation3 + $0x18] sm:$0xff] (!%p1461_p13), %v1608_v20  ;;  %971 = vst [vmem:[#allocation3 + $0x58] sm:$0xff] (!%p1461_p13), %v1616_v21 }
 0x2b3   : > { %961 = vst [vmem:[#allocation3 + $0x8] sm:$0xff] (!%p1461_p13), %v897_v22  ;;  %969 = vst [vmem:[#allocation3 + $0x48] sm:$0xff] (!%p1461_p13), %v929_v23 }
 0x2b4   : > { %959 = sbr.rel (%p1461_p13) target bundleno = 700 (0x2bc), region = 56 }
 0x2b7   : > { %v1611_v24 = vpop.f32.mrb[4].mxu0  ;;  %v2516_v25 = vpop.f32.mrb[4].mxu1 }
 0x2b8   : > { %v910_v26 = vpop.f32.mrb[5].mxu0  ;;  %v942_v27 = vpop.f32.mrb[5].mxu1  ;;  %966 = vst [vmem:[#allocation3 + $0x30] sm:$0xff] (!%p1461_p13), %v1611_v24  ;;  %974 = vst [vmem:[#allocation3 + $0x70] sm:$0xff] (!%p1461_p13), %v2516_v25 }
 0x2b9   : > { %v1612_v28 = vpop.f32.mrb[6].mxu0  ;;  %v2518_v29 = vpop.f32.mrb[6].mxu1  ;;  %964 = vst [vmem:[#allocation3 + $0x20] sm:$0xff] (!%p1461_p13), %v910_v26  ;;  %972 = vst [vmem:[#allocation3 + $0x60] sm:$0xff] (!%p1461_p13), %v942_v27 }
 0x2ba   : > { %v913_v30 = vpop.f32.mrb[7].mxu0  ;;  %v945_v31 = vpop.f32.mrb[7].mxu1  ;;  %967 = vst [vmem:[#allocation3 + $0x38] sm:$0xff] (!%p1461_p13), %v1612_v28  ;;  %975 = vst [vmem:[#allocation3 + $0x78] sm:$0xff] (!%p1461_p13), %v2518_v29 }
 0x2bb   : > { %965 = vst [vmem:[#allocation3 + $0x28] sm:$0xff] %v913_v30  ;;  %973 = vst [vmem:[#allocation3 + $0x68] sm:$0xff] %v945_v31 }
 0x2bc PF: > { %979 = sbr.rel (%p290_p6) target bundleno = 712 (0x2c8), region = 60  ;;  %v980_v32 = vld [vmem:[#allocation3] sm:$0xff] (!%p290_p6)  ;;  %v981_v33 = vld [vmem:[#allocation3 + $0x8] sm:$0xff] (!%p290_p6)  ;;  %v982_v34 = vld [vmem:[#allocation3 + $0x10] sm:$0xff] (!%p290_p6) }
 0x2bd   : > { %v996_v35 = vadd.f32 (!%p290_p6), %v980_v32, %v894_v18  ;;  %v997_v36 = vadd.f32 (!%p290_p6), %v981_v33, %v897_v22  ;;  %v998_v37 = vadd.f32 (!%p290_p6), %v1607_v16, %v982_v34  ;;  %v983_v38 = vld [vmem:[#allocation3 + $0x18] sm:$0xff] (!%p290_p6)  ;;  %v988_v46 = vld [vmem:[#allocation3 + $0x40] sm:$0xff] (!%p290_p6)  ;;  %v989_v50 = vld [vmem:[#allocation3 + $0x48] sm:$0xff] (!%p290_p6) }
 0x2be   : > { %v999_v41 = vadd.f32 (!%p290_p6), %v1608_v20, %v983_v38  ;;  %v1004_v49 = vadd.f32 (!%p290_p6), %v988_v46, %v926_v19  ;;  %v990_v51 = vld [vmem:[#allocation3 + $0x50] sm:$0xff] (!%p290_p6)  ;;  %v991_v52 = vld [vmem:[#allocation3 + $0x58] sm:$0xff] (!%p290_p6)  ;;  %v1005_v53 = vadd.f32 (!%p290_p6), %v989_v50, %v929_v23 }
 0x2bf   : > { %1012 = vst [vmem:[#allocation3] sm:$0xff] (!%p290_p6), %v996_v35  ;;  %1013 = vst [vmem:[#allocation3 + $0x8] sm:$0xff] (!%p290_p6), %v997_v36  ;;  %v1006_v54 = vadd.f32 (!%p290_p6), %v1615_v17, %v990_v51  ;;  %v1007_v55 = vadd.f32 (!%p290_p6), %v1616_v21, %v991_v52 }
 0x2c0   : > { %v986_v44 = vld [vmem:[#allocation3 + $0x30] sm:$0xff] (!%p290_p6)  ;;  %1014 = vst [vmem:[#allocation3 + $0x10] sm:$0xff] (!%p290_p6), %v998_v37  ;;  %1015 = vst [vmem:[#allocation3 + $0x18] sm:$0xff] (!%p290_p6), %v999_v41 }
 0x2c1   : > { %v984_v39 = vld [vmem:[#allocation3 + $0x20] sm:$0xff] (!%p290_p6)  ;;  %v1002_v47 = vadd.f32 (!%p290_p6), %v1611_v24, %v986_v44  ;;  %v994_v58 = vld [vmem:[#allocation3 + $0x70] sm:$0xff] (!%p290_p6)  ;;  %1020 = vst [vmem:[#allocation3 + $0x40] sm:$0xff] (!%p290_p6), %v1004_v49  ;;  %1021 = vst [vmem:[#allocation3 + $0x48] sm:$0xff] (!%p290_p6), %v1005_v53 }
 0x2c2   : > { %v985_v40 = vld [vmem:[#allocation3 + $0x28] sm:$0xff] (!%p290_p6)  ;;  %v1000_v42 = vadd.f32 (!%p290_p6), %v984_v39, %v910_v26  ;;  %v987_v45 = vld [vmem:[#allocation3 + $0x38] sm:$0xff] (!%p290_p6)  ;;  %v992_v56 = vld [vmem:[#allocation3 + $0x60] sm:$0xff] (!%p290_p6)  ;;  %v1010_v61 = vadd.f32 (!%p290_p6), %v2516_v25, %v994_v58  ;;  %1022 = vst [vmem:[#allocation3 + $0x50] sm:$0xff] (!%p290_p6), %v1006_v54 }
 0x2c3   : > { %v1001_v43 = vadd.f32 %v985_v40, %v913_v30  ;;  %v1003_v48 = vadd.f32 %v1612_v28, %v987_v45  ;;  %v993_v57 = vld [vmem:[#allocation3 + $0x68] sm:$0xff]  ;;  %1018 = vst [vmem:[#allocation3 + $0x30] sm:$0xff] %v1002_v47  ;;  %v1008_v59 = vadd.f32 %v992_v56, %v942_v27  ;;  %v995_v62 = vld [vmem:[#allocation3 + $0x78] sm:$0xff]  ;;  %1023 = vst [vmem:[#allocation3 + $0x58] sm:$0xff] %v1007_v55 }
 0x2c4   : > { %1016 = vst [vmem:[#allocation3 + $0x20] sm:$0xff] %v1000_v42  ;;  %v1009_v60 = vadd.f32 %v993_v57, %v945_v31  ;;  %v1011_v63 = vadd.f32 %v2518_v29, %v995_v62  ;;  %1026 = vst [vmem:[#allocation3 + $0x70] sm:$0xff] %v1010_v61 }
 0x2c5   : > { %1017 = vst [vmem:[#allocation3 + $0x28] sm:$0xff] %v1001_v43  ;;  %1019 = vst [vmem:[#allocation3 + $0x38] sm:$0xff] %v1003_v48 }
 0x2c6   : > { %1024 = vst [vmem:[#allocation3 + $0x60] sm:$0xff] %v1008_v59  ;;  %1025 = vst [vmem:[#allocation3 + $0x68] sm:$0xff] %v1009_v60 }
 0x2c7   : > { %1027 = vst [vmem:[#allocation3 + $0x78] sm:$0xff] %v1011_v63 }
 0x2c8 PF: > { %p1487_p0 = scmp.ne.s32.totalorder %s2105_s18, 3 }
 0x2c9   : > { %p1488_p9 = scmp.ge.s32.totalorder (!%p1487_p0), %s2113_s20, 1 }
 0x2ca   : > { %1031 = sbr.rel (%p1487_p0) target bundleno = 988 (0x3dc), region = 64 }
 0x2cb   : > { %v1032_v0 = vld [vmem:[#allocation3] sm:$0xff] (!%p1487_p0)  ;;  %v1033_v1 = vld [vmem:[#allocation3 + $0x8] sm:$0xff] (!%p1487_p0)  ;;  %v1046_v18 = vld [vmem:[#allocation3 + $0x70] sm:$0xff] (!%p1487_p0) }
 0x2cc   : > { %v1034_v2 = vld [vmem:[#allocation3 + $0x10] sm:$0xff] (!%p1487_p0)  ;;  %v1035_v3 = vld [vmem:[#allocation3 + $0x18] sm:$0xff] (!%p1487_p0)  ;;  %v1036_v4 = vld [vmem:[#allocation3 + $0x20] sm:$0xff] (!%p1487_p0)  ;;  %v1048_v6 = vpack.c.bf16 (!%p1487_p0), %v1033_v1, %v1032_v0 }
 0x2cd   : > { %v1037_v5 = vld [vmem:[#allocation3 + $0x28] sm:$0xff] (!%p1487_p0)  ;;  %v1039_v8 = vld [vmem:[#allocation3 + $0x38] sm:$0xff] (!%p1487_p0)  ;;  %v1040_v9 = vld [vmem:[#allocation3 + $0x40] sm:$0xff] (!%p1487_p0)  ;;  %v2529_v10 = vpack.c.bf16 (!%p1487_p0), %v1035_v3, %v1034_v2 }
 0x2ce   : > { %v2531_v11 = vpack.c.bf16 (!%p1487_p0), %v1037_v5, %v1036_v4  ;;  %v1041_v12 = vld [vmem:[#allocation3 + $0x48] sm:$0xff] (!%p1487_p0)  ;;  %v1042_v13 = vld [vmem:[#allocation3 + $0x50] sm:$0xff] (!%p1487_p0)  ;;  %v1044_v16 = vld [vmem:[#allocation3 + $0x60] sm:$0xff] (!%p1487_p0) }
 0x2cf   : > { %v1038_v7 = vld [vmem:[#allocation3 + $0x30] sm:$0xff] (!%p1487_p0)  ;;  %v1043_v14 = vld [vmem:[#allocation3 + $0x58] sm:$0xff] (!%p1487_p0)  ;;  %v1045_v17 = vld [vmem:[#allocation3 + $0x68] sm:$0xff] (!%p1487_p0)  ;;  %v1052_v19 = vpack.c.bf16 (!%p1487_p0), %v1041_v12, %v1040_v9 }
 0x2d0   : > { %v2533_v15 = vpack.c.bf16 (!%p1487_p0), %v1039_v8, %v1038_v7  ;;  %v2535_v20 = vpack.c.bf16 (!%p1487_p0), %v1043_v14, %v1042_v13  ;;  %v1047_v21 = vld [vmem:[#allocation3 + $0x78] sm:$0xff] (!%p1487_p0)  ;;  %v2537_v22 = vpack.c.bf16 (!%p1487_p0), %v1045_v17, %v1044_v16 }
 0x2d1   : > { %v2539_v23 = vpack.c.bf16 %v1047_v21, %v1046_v18  ;;  %1059 = sbr.rel (%p1488_p9) target bundleno = 730 (0x2da), region = 68  ;;  %s1060_s11 = sshra.s32 (!%p1488_p9), %s1460_s28, 4 }
 0x2d2   : > { %s1489_s6 = sshll.u32 (!%p1488_p9), %s2750_s2, 5 }
 0x2d3   : > { %s1063_s10 = sadd.s32 (!%p1488_p9), %s1489_s6, %s1060_s11 }
 0x2d4   : > { %s1490_s5 = sshll.u32 (!%p1488_p9), %s1063_s10, 3 }
 0x2d5   : > { %s1065_s29 = scalar_lea.vmem (!%p1488_p9), [#allocation2], %s1490_s5 }
 0x2d6   : > { %1066 = vst [vmem:[%s1065_s29] sm:$0xff] (!%p1488_p9), %v1048_v6  ;;  %1067 = vst [vmem:[%s1065_s29 + $0x8] sm:$0xff] (!%p1488_p9), %v2529_v10 }
 0x2d7   : > { %1068 = vst [vmem:[%s1065_s29 + $0x10] sm:$0xff] (!%p1488_p9), %v2531_v11  ;;  %1069 = vst [vmem:[%s1065_s29 + $0x18] sm:$0xff] (!%p1488_p9), %v2533_v15 }
 0x2d8   : > { %1070 = vst [vmem:[%s1065_s29 + $0x20] sm:$0xff] %v1052_v19  ;;  %1071 = vst [vmem:[%s1065_s29 + $0x28] sm:$0xff] %v2535_v20 }
 0x2d9   : > { %1072 = vst [vmem:[%s1065_s29 + $0x30] sm:$0xff] %v2537_v22  ;;  %1073 = vst [vmem:[%s1065_s29 + $0x38] sm:$0xff] %v2539_v23 }
 0x2da PF: > { %p1491_p7 = scmp.ne.s32.totalorder %s2113_s20, 1 }
 0x2db   : > { %v1893_v24 = vld [vmem:[#allocation9 + $0x80] sm:$0xff] (!%p1491_p7)   ;;  %1637 = vmatprep.mubr.bf16.mxu0 (!%p1491_p7), %v1048_v6  ;;  %1645 = vmatprep.mubr.bf16.mxu1 (!%p1491_p7), %v1052_v19  ;;  %v1894_v25 = vld [vmem:[#allocation9 + $0x88] sm:$0xff] (!%p1491_p7)   ;;  %v1895_v26 = vld [vmem:[#allocation9 + $0x90] sm:$0xff] (!%p1491_p7)  }
 0x2dc   : > { %1077 = sbr.rel (%p1491_p7) target bundleno = 988 (0x3dc), region = 72  ;;  %1621 = vmatprep.subr.bf16.mxu0 (!%p1491_p7), %v1893_v24  ;;  %1685 = vmatprep.subr.bf16.mxu1 (!%p1491_p7), %v1893_v24  ;;  %v1896_v27 = vld [vmem:[#allocation9 + $0x98] sm:$0xff] (!%p1491_p7)   ;;  %v1897_v28 = vld [vmem:[#allocation9 + $0xa0] sm:$0xff] (!%p1491_p7)   ;;  %v1898_v29 = vld [vmem:[#allocation9 + $0xa8] sm:$0xff] (!%p1491_p7)  }
 0x2dd   : > { %1622 = vmatpush3.bf16.msra.mxu0 (!%p1491_p7), %v1893_v24  ;;  %1693 = vmatpush3.bf16.msra.mxu1 (!%p1491_p7), %v1893_v24  ;;  %v1899_v30 = vld [vmem:[#allocation9 + $0xb0] sm:$0xff] (!%p1491_p7)   ;;  %v1900_v31 = vld [vmem:[#allocation9 + $0xb8] sm:$0xff] (!%p1491_p7)  }
 0x2de   : > { %1623 = vmatprep.subr.bf16.mxu0 (!%p1491_p7), %v1894_v25  ;;  %1686 = vmatprep.subr.bf16.mxu1 (!%p1491_p7), %v1894_v25 }
 0x2e1   : > { %1624 = vmatpush3.bf16.msra.mxu0 (!%p1491_p7), %v1894_v25  ;;  %1694 = vmatpush3.bf16.msra.mxu1 (!%p1491_p7), %v1894_v25 }
 0x2e2   : > { %1625 = vmatprep.subr.bf16.mxu0 (!%p1491_p7), %v1895_v26  ;;  %1687 = vmatprep.subr.bf16.mxu1 (!%p1491_p7), %v1895_v26 }
 0x2e5   : > { %1626 = vmatpush3.bf16.msra.mxu0 %v1895_v26  ;;  %1695 = vmatpush3.bf16.msra.mxu1 %v1895_v26 }
 0x2e6   : > { %1627 = vmatprep.subr.bf16.mxu0 %v1896_v27  ;;  %1688 = vmatprep.subr.bf16.mxu1 %v1896_v27 }
 0x2e9   : > { %1628 = vmatpush3.bf16.msra.mxu0 %v1896_v27  ;;  %1696 = vmatpush3.bf16.msra.mxu1 %v1896_v27 }
 0x2ea   : > { %1629 = vmatprep.subr.bf16.mxu0 %v1897_v28  ;;  %1689 = vmatprep.subr.bf16.mxu1 %v1897_v28 }
 0x2ed   : > { %1630 = vmatpush3.bf16.msra.mxu0 %v1897_v28  ;;  %1697 = vmatpush3.bf16.msra.mxu1 %v1897_v28 }
 0x2ee   : > { %1631 = vmatprep.subr.bf16.mxu0 %v1898_v29  ;;  %1690 = vmatprep.subr.bf16.mxu1 %v1898_v29 }
 0x2f1   : > { %1632 = vmatpush3.bf16.msra.mxu0 %v1898_v29  ;;  %1698 = vmatpush3.bf16.msra.mxu1 %v1898_v29 }
 0x2f2   : > { %1633 = vmatprep.subr.bf16.mxu0 %v1899_v30  ;;  %1691 = vmatprep.subr.bf16.mxu1 %v1899_v30 }
 0x2f5   : > { %1634 = vmatpush3.bf16.msra.mxu0 %v1899_v30  ;;  %1699 = vmatpush3.bf16.msra.mxu1 %v1899_v30 }
 0x2f6   : > { %1635 = vmatprep.subr.bf16.mxu0 %v1900_v31  ;;  %1692 = vmatprep.subr.bf16.mxu1 %v1900_v31 }
 0x2f9   : > { %1636 = vmatpush3.bf16.msra.mxu0 %v1900_v31  ;;  %1700 = vmatpush3.bf16.msra.mxu1 %v1900_v31 }
 0x2fc   : > { %1638 = vmatmul.mubr.bf16.vlgmr.msra.gmra.mrb[0].mxu0 %v2529_v10  ;;  %1646 = vmatmul.mubr.bf16.vlgmr.msra.gmra.mrb[0].mxu1 %v2535_v20 }
 0x2fd   : > { %1641 = vmatprep.mubr.bf16.mxu0 %v2531_v11  ;;  %1649 = vmatprep.mubr.bf16.mxu1 %v2537_v22 }
 0x304   : > { %1642 = vmatmul.mubr.bf16.gmra.mrb[4].mxu0 %v2533_v15  ;;  %1650 = vmatmul.mubr.bf16.gmra.mrb[4].mxu1 %v2539_v23 }
 0x3cf   : > { %v1639_v32 = vpop.f32.mrb[0].mxu0  ;;  %v1647_v33 = vpop.f32.mrb[0].mxu1 }
 0x3d0   : > { %1242 = vst [vmem:[%s2450_s8 + $0x10] sm:$0xff] %v1639_v32  ;;  %1250 = vst [vmem:[%s2450_s8 + $0x50] sm:$0xff] %v1647_v33  ;;  %v1177_v34 = vpop.f32.mrb[1].mxu0  ;;  %v1209_v35 = vpop.f32.mrb[1].mxu1 }
 0x3d1   : > { %1240 = vst [vmem:[%s2450_s8] sm:$0xff] %v1177_v34  ;;  %1248 = vst [vmem:[%s2450_s8 + $0x40] sm:$0xff] %v1209_v35  ;;  %v1640_v36 = vpop.f32.mrb[2].mxu0  ;;  %v1648_v37 = vpop.f32.mrb[2].mxu1 }
 0x3d2   : > { %1243 = vst [vmem:[%s2450_s8 + $0x18] sm:$0xff] %v1640_v36  ;;  %1251 = vst [vmem:[%s2450_s8 + $0x58] sm:$0xff] %v1648_v37  ;;  %v1180_v38 = vpop.f32.mrb[3].mxu0  ;;  %v1212_v39 = vpop.f32.mrb[3].mxu1 }
 0x3d3   : > { %1241 = vst [vmem:[%s2450_s8 + $0x8] sm:$0xff] %v1180_v38  ;;  %1249 = vst [vmem:[%s2450_s8 + $0x48] sm:$0xff] %v1212_v39 }
 0x3d7   : > { %v1643_v40 = vpop.f32.mrb[4].mxu0  ;;  %v1651_v41 = vpop.f32.mrb[4].mxu1 }
 0x3d8   : > { %1246 = vst [vmem:[%s2450_s8 + $0x30] sm:$0xff] %v1643_v40  ;;  %1254 = vst [vmem:[%s2450_s8 + $0x70] sm:$0xff] %v1651_v41  ;;  %v1193_v42 = vpop.f32.mrb[5].mxu0  ;;  %v1225_v43 = vpop.f32.mrb[5].mxu1 }
 0x3d9   : > { %1244 = vst [vmem:[%s2450_s8 + $0x20] sm:$0xff] %v1193_v42  ;;  %1252 = vst [vmem:[%s2450_s8 + $0x60] sm:$0xff] %v1225_v43  ;;  %v1644_v44 = vpop.f32.mrb[6].mxu0  ;;  %v1652_v45 = vpop.f32.mrb[6].mxu1 }
 0x3da   : > { %1247 = vst [vmem:[%s2450_s8 + $0x38] sm:$0xff] %v1644_v44  ;;  %1255 = vst [vmem:[%s2450_s8 + $0x78] sm:$0xff] %v1652_v45  ;;  %v1196_v46 = vpop.f32.mrb[7].mxu0  ;;  %v1228_v47 = vpop.f32.mrb[7].mxu1 }
 0x3db   : > { %1245 = vst [vmem:[%s2450_s8 + $0x28] sm:$0xff] %v1196_v46  ;;  %1253 = vst [vmem:[%s2450_s8 + $0x68] sm:$0xff] %v1228_v47 }
 0x3dc PF: > { %s2709_s2 = sld [smem:[#allocation17_spill]]  ;;  %p1264_p3 = scmp.eq.s32.totalorder %s2113_s20, 1 }
 0x3dd   : > { %p1265_p12 = scmp.eq.s32.totalorder %s2105_s18, 3  ;;  %s1502_s28 = sshll.u32 %s2109_s19, 4 }
 0x3de   : > { %s1277_s4 = sshll.u32 %s2450_s8, 4  ;;  %s2710_s3 = sld [smem:[#allocation23_spill]]  ;;  %s2579_s4 = int_to_ptr.vmem [resolvable:$true] %s1277_s4 }
 0x3df   : > { %p1266_p1 = pnand %p1265_p12, %p1264_p3  ;;  %s2588_s9 = scalar_lea.sflag [#allocation6], %s250_s23 }
 0x3e0   : > { %s1987_s18 = scalar_lea.vmem %s2579_s4, 2048  ;;  %s2137_s19 = smov [#allocation10]  }
 0x3e1   : > { %s2752_s20 = smov (!%p1266_p1, %s2113_s20), 2  ;;  %p1988_p2 = scmp.ne.s32.totalorder %s2579_s4, %s1987_s18 }
 0x3e2   : > { %s1503_s7 = sshll.u32 %s2752_s20, 6  ;;  %p2711_p8 = scmp.ne.s32.totalorder %s2709_s2, 0 }
 0x3e3   : > { %s1274_s12 = sadd.s32 %s1503_s7, %s1502_s28  ;;  %s1991_s20 = sshll.u32 %s2137_s19, 4  ;;  %s1992_s20 = int_to_ptr.vmem [resolvable:$false] %s1991_s20 }
 0x3e4   : > { %s1504_s1 = sshll.u32 %s1274_s12, 7  ;;  %p1989_p4 = pnand %p1988_p2, %p2711_p8 }
 0x3e5   : > { %s2584_s26 = scalar_lea.hbm %s2710_s3, %s1504_s1  ;;  %s1993_s8 = scalar_lea.vmem %s1992_s20, 4096 }
 0x3e6   : > { %p1990_p6 = pneg %p1989_p4  ;;  %p1994_p10 = scmp.lt.s32.totalorder %s2579_s4, %s1992_s20 }
 0x3e7   : > { %p1995_p11 = scmp.lt.s32.totalorder %s1993_s8, %s1987_s18 }
 0x3e9   : > { %p1996_p5 = por %p1995_p11, %p1994_p10 }
 0x3eb   : > { %p1997_p13 = pnand %p1996_p5, %p1990_p6 }
 0x3ed   : > { %2000 = shalt.err (!%p1997_p13)
}
 0x3ee   : > { %s2001_s23 = scalar_lea.hbm %s2584_s26, 2048  ;;  %s2005_s10 = scalar_lea.hbm %s2710_s3, 24576 }
 0x3ef   : > { %p2002_p0 = scmp.ne.s32.totalorder %s2584_s26, %s2001_s23  ;;  %p2006_p3 = scmp.lt.u32.totalorder %s2584_s26, %s2710_s3 }
 0x3f0   : > { %p2007_p12 = scmp.lt.u32.totalorder %s2005_s10, %s2001_s23  ;;  %p2009_p2 = scmp.lt.u32.totalorder %s2001_s23, %s2584_s26 }
 0x3f1   : > { %p2003_p9 = pnand %p2002_p0, %p2711_p8 }
 0x3f2   : > { %p2008_p1 = por %p2007_p12, %p2006_p3 }
 0x3f3   : > { %p2004_p7 = pneg %p2003_p9 }
 0x3f4   : > { %p2010_p4 = por %p2009_p2, %p2008_p1 }
 0x3f6   : > { %p2011_p6 = pnand %p2010_p4, %p2004_p7 }
 0x3f8   : > { %2014 = shalt.err (!%p2011_p6)
}
 0x3f9   : > { %s2138_s28 = smov 128   ;;  %s2139_s7 = smov 8  }
 0x3fa   : > { %1711 = dma.vmem_to_hbm [thread:$0]  (%p2711_p8), %s2579_s4, 2048, %s2584_s26, %s2588_s9, %s2138_s28, %s2138_s28, %s2139_s7  }
 0x3fb PF: > { %s2712_s12 = sld [smem:[#allocation16_spill]]  ;;  %s2713_s1 = sld [smem:[#allocation14_spill]] }
 0x3fc   : > { %s2714_s27 = sld [smem:[#allocation18_spill]] }
 0x401   : > { %p1733_p10 = scmp.ge.s32.totalorder %s2712_s12, 2  ;;  %s1292_s30 = sand.u32 1, %s2713_s1  }
 0x402   : > { %p2715_p11 = scmp.ne.s32.totalorder %s2714_s27, 0  ;;  %s1293_s18 = scalar_lea.sflag [#allocation6], %s1292_s30 }
 0x404   : > { %p1725_p5 = pnand %p1733_p10, %p2715_p11 }
 0x406   : > { %2076 = dma.done.wait (!%p1725_p5), %s1293_s18, 2048  }
 0x407   : > { %2078 = vsyncadd (!%p1725_p5), %s1293_s18, 4294965248  ;;  %s20_s8 = sadd.s32 1, %s2712_s12   ;;  %s2717_s20 = sld [smem:[#allocation15_spill]] }
 0x408   : > { %p2617_p13 = scmp.ge.s32.totalorder %s20_s8, 34   ;;  %s2718_s2 = sld [smem:[#allocation19_spill]] }
 0x409   : > { %s2719_s4 = sld [smem:[#allocation20_spill]]  ;;  %s2721_s12 = smov %s2085_s13 }
 0x40a   : > { %s2722_s13 = smov %s2089_s14  ;;  %s2723_s14 = smov %s2419_s15 }
 0x40b   : > { %s2724_s15 = smov %s2097_s16  ;;  %s2725_s16 = smov %s2101_s17 }
 0x40c   : > { %s2726_s17 = smov %s2366_s24  ;;  %s2727_s18 = smov %s2117_s21 }
 0x40d   : > { %s2728_s19 = smov %s2121_s22  ;;  %s2731_s23 = smov %s2742_s25 }
 0x40e   : > { %s2729_s21 = smov %s2718_s2  ;;  %s2732_s24 = smov %s20_s8 }
 0x40f   : > { %s2730_s22 = smov %s2719_s4  ;;  %19 = sbr.rel (!%p2617_p13) target bundleno = 15 (0xf), region = 118 }
 0x416   :  { %1298 = vsyncpa [#allocation5], 1 }
 0x417   :  { %1300 = vsyncpa [#allocation5 + $0x1], 1 }
 0x418   :  { %1301 = vsyncpa [#allocation8], 1 }
 0x419   :  { %1302 = vsyncpa [#allocation6], 1 }
 0x41a   :  { %1304 = vsyncpa [#allocation6 + $0x1], 1 }

</bundles_post_ra>
